<compile_context>
chip_gen: v5e
topology: v5e:2x2
jax: 0.10.0
libtpu: 0.0.40
codegen_flags: <defaults>
</compile_context>

<pallas_src>
from functools import partial

import jax
import jax.numpy as jnp
from jax.experimental import pallas as pl
from jax.experimental.pallas import tpu as pltpu


def keyword_cnn_kernel(x_ref, wtap_ref, bconv_ref, w1_ref, b1_ref,
                       w2_ref, b2_ref, out_ref, *, valid_T):
    # x_ref:    (Bt, Lp, F)   compute_dtype, time on sublanes (Lp = L rounded
    #                         up to the sublane tile; padded rows are zero)
    # wtap_ref: (M, F, K)     per-tap conv weights, wtap[m, f, k] = w[k,0,f,m]
    # bconv_ref:(1, 1, K) fp32
    # w1_ref:   (K, H), b1_ref: (1, H) fp32
    # w2_ref:   (H, Cp), b2_ref: (1, Cp) fp32 (-1e30 on padded class lanes)
    # out_ref:  (1, Bt, Cp) fp32  lane-dense log-softmax output block
    Bt, Lp, F = x_ref.shape
    M, _, K = wtap_ref.shape
    pad = M - 1
    Tfull = Lp + pad                     # accumulator time length (>= valid_T)

    # x used directly in compute_dtype: no cast, no padding, no im2col copy.
    x2 = x_ref[...].reshape(Bt * Lp, F)                      # (Bt*Lp, F)

    # Conv as M per-tap MXU matmuls with fp32 accumulation at shifted time
    # offsets.  Missing border contributions correspond exactly to the conv's
    # zero padding, so no padded/shifted copy of x is ever built.
    acc = jnp.zeros((Bt, Tfull, K), jnp.float32)
    for m in range(M):                                       # M is small/static
        p = jnp.dot(x2, wtap_ref[m],
                    preferred_element_type=jnp.float32)      # (Bt*Lp, K) fp32
        p = p.reshape(Bt, Lp, K)
        front, back = pad - m, m
        pieces = []
        if front:
            pieces.append(jnp.zeros((Bt, front, K), jnp.float32))
        pieces.append(p)
        if back:
            pieces.append(jnp.zeros((Bt, back, K), jnp.float32))
        acc = acc + (pieces[0] if len(pieces) == 1
                     else jnp.concatenate(pieces, axis=1))   # (Bt, Tfull, K)

    conv = jnp.maximum(acc + bconv_ref[...], 0.0)            # bias + ReLU, fp32

    # Mean over the valid_T true conv steps: masked sublane reduction (XLU),
    # replacing the old block-diagonal pmat matmul (no MXU / VMEM / DMA cost).
    tmask = jax.lax.broadcasted_iota(jnp.int32, (1, Tfull, 1), 1) < valid_T
    tscale = tmask.astype(jnp.float32) * (1.0 / valid_T)     # (1, Tfull, 1)
    pooled = jnp.sum(conv * tscale, axis=1)                  # (Bt, K) fp32

    h1 = jnp.dot(pooled.astype(w1_ref.dtype), w1_ref[...],
                 preferred_element_type=jnp.float32) + b1_ref[...]
    h1 = jnp.maximum(h1, 0.0)                                # (Bt, H) fp32
    logits = jnp.dot(h1.astype(w2_ref.dtype), w2_ref[...],
                     preferred_element_type=jnp.float32) + b2_ref[...]  # (Bt, Cp)

    # log_softmax over classes; padded classes carry an fp32 -1e30 bias so
    # exp == 0 and the real-class values are exact.
    zmax = jnp.max(logits, axis=1, keepdims=True)
    z = logits - zmax
    lse = jnp.log(jnp.sum(jnp.exp(z), axis=1, keepdims=True))
    out_ref[0] = z - lse


def _round_up(n, m):
    return ((n + m - 1) // m) * m


@partial(jax.jit, static_argnames=("batch_tile", "compute_dtype"))
def keyword_cnn2d_forward(x, params, *, batch_tile=None, compute_dtype=jnp.bfloat16):
    """x: (B, 1, F, L) NCHW fp32. Returns (B, min(C, L)) fp32 log-softmax rows."""
    B, cin, F, L = x.shape
    assert cin == 1
    K, _, _, M = params["w_conv"].shape
    H = params["w1"].shape[1]
    C = params["w2"].shape[1]
    pad = M - 1
    T = L + pad                                   # true conv output length
    Cp = _round_up(C, 128)                        # lane-dense class axis
    sub = 8 * (4 // jnp.dtype(compute_dtype).itemsize)
    Lp = _round_up(L, sub)                        # sublane-tile aligned length

    # Batch tile: large (MXU rows on the FC path), but >= 2 grid steps when
    # the batch allows so v7x's two TensorCores both get a share.
    if batch_tile is None:
        n_steps = max(1, -(-B // 256))            # cap Bt around 256
        if B >= 16:
            n_steps = max(n_steps, 2)             # v7x megacore: nB >= 2
        batch_tile = _round_up(-(-B // n_steps), 8)
    Bt = max(1, min(batch_tile, _round_up(B, 8)))
    nB = -(-B // Bt)
    Bp = nB * Bt

    # ---- glue (fused inside this jit) ----
    xs = jnp.transpose(x[:, 0], (0, 2, 1))                    # (B, L, F) time-major
    xs = jnp.pad(xs, ((0, Bp - B), (0, Lp - L), (0, 0)))      # zero rows: safe
    xs = xs.astype(compute_dtype)

    # Per-tap conv weights: wtap[m, f, k] == w_conv[k, 0, f, m]
    wtap = jnp.transpose(params["w_conv"][:, 0], (2, 1, 0)).astype(compute_dtype)
    bconv = params["b_conv"].reshape(1, 1, K).astype(jnp.float32)

    w1 = params["w1"].astype(compute_dtype)                   # (K, H)
    b1 = params["b1"].reshape(1, H).astype(jnp.float32)
    w2 = jnp.zeros((H, Cp), compute_dtype).at[:, :C].set(
        params["w2"].astype(compute_dtype))                   # (H, Cp)
    b2 = jnp.full((1, Cp), -1e30, jnp.float32).at[:, :C].set(
        params["b2"].reshape(1, C).astype(jnp.float32))       # fp32, never cast

    const2 = lambda i: (0, 0)
    const3 = lambda i: (0, 0, 0)
    single = pl.Buffered(1)      # resident weights: no double-buffering needed

    out = pl.pallas_call(
        partial(keyword_cnn_kernel, valid_T=T),
        out_shape=jax.ShapeDtypeStruct((nB, Bt, Cp), jnp.float32),
        grid=(nB,),
        in_specs=[
            pl.BlockSpec((Bt, Lp, F), lambda i: (i, 0, 0)),   # x: gridded batch
            pl.BlockSpec((M, F, K), const3, pipeline_mode=single),
            pl.BlockSpec((1, 1, K), const3, pipeline_mode=single),
            pl.BlockSpec((K, H), const2, pipeline_mode=single),
            pl.BlockSpec((1, H), const2, pipeline_mode=single),
            pl.BlockSpec((H, Cp), const2, pipeline_mode=single),
            pl.BlockSpec((1, Cp), const2, pipeline_mode=single),
        ],
        out_specs=pl.BlockSpec((1, Bt, Cp), lambda i: (i, 0, 0)),
        compiler_params=pltpu.CompilerParams(
            dimension_semantics=("parallel",),    # megacore batch split on v7x
        ),
    )(xs, wtap, bconv, w1, b1, w2, b2)

    out = out.reshape(Bp, Cp)[:B]
    # matches torch: output.view(B, -1)[:, :signal_length]
    return out[:, :min(C, L)]


def reference_forward(x, params):
    """Pure-JAX fp32 reference mirroring the PyTorch module."""
    B, _, _, L = x.shape
    M = params["w_conv"].shape[-1]
    hp = jax.lax.Precision.HIGHEST
    conv = jax.lax.conv_general_dilated(
        x, params["w_conv"], window_strides=(1, 1),
        padding=((0, 0), (M - 1, M - 1)),
        dimension_numbers=("NCHW", "OIHW", "NCHW"), precision=hp)
    conv = jnp.maximum(conv + params["b_conv"].reshape(1, -1, 1, 1), 0.0)
    pooled = jnp.mean(conv, axis=3).reshape(B, -1)                 # (B, K)
    h1 = jnp.maximum(jnp.dot(pooled, params["w1"], precision=hp)
                     + params["b1"], 0.0)
    logits = jnp.dot(h1, params["w2"], precision=hp) + params["b2"]
    out = jax.nn.log_softmax(logits, axis=1)
    return out.reshape(B, -1)[:, :L]


if __name__ == "__main__":
    # Small, deterministic synthetic config.
    B, F, L = 8, 4, 16          # batch, num_features, sequence length
    K, M, C = 8, 3, 10          # num_kernels, mem_depth, num_classes
    H = 1024                    # hidden size fixed by the module

    key = jax.random.PRNGKey(0)
    ks = jax.random.split(key, 7)
    # Linear weights stored pre-transposed (in, out) so y = x @ W + b.
    params = {
        "w_conv": 0.1 * jax.random.normal(ks[0], (K, 1, F, M), jnp.float32),
        "b_conv": 0.1 * jax.random.normal(ks[1], (K,), jnp.float32),
        "w1": 0.05 * jax.random.normal(ks[2], (K, H), jnp.float32),
        "b1": 0.05 * jax.random.normal(ks[3], (H,), jnp.float32),
        "w2": 0.05 * jax.random.normal(ks[4], (H, C), jnp.float32),
        "b2": 0.05 * jax.random.normal(ks[5], (C,), jnp.float32),
    }
    x = jax.random.normal(ks[6], (B, 1, F, L), jnp.float32)

    ref = reference_forward(x, params)

    # fp32 path with an explicit 2-step grid: tight numerical check.
    out_f32 = jax.block_until_ready(
        keyword_cnn2d_forward(x, params, batch_tile=4, compute_dtype=jnp.float32))
    assert out_f32.shape == (B, min(C, L)), out_f32.shape
    assert jnp.allclose(out_f32, ref, atol=2e-3, rtol=2e-3)

    # bf16 default path (auto batch_tile): looser tolerance from bf16 operands.
    out_bf16 = jax.block_until_ready(keyword_cnn2d_forward(x, params))
    assert out_bf16.shape == (B, min(C, L)), out_bf16.shape
    assert jnp.allclose(out_bf16, ref, atol=3e-2, rtol=3e-2)

    print("KERNEL_OK")
</pallas_src>

<mosaic_0001>
module attributes {stable_mosaic.version = 11 : i64} {
  func.func @keyword_cnn_kernel(%arg0: i32, %arg1: memref<4x16x4xf32, #tpu.memory_space<vmem>>, %arg2: memref<3x4x8xf32, #tpu.memory_space<vmem>>, %arg3: memref<1x1x8xf32, #tpu.memory_space<vmem>>, %arg4: memref<8x1024xf32, #tpu.memory_space<vmem>>, %arg5: memref<1x1024xf32, #tpu.memory_space<vmem>>, %arg6: memref<1024x128xf32, #tpu.memory_space<vmem>>, %arg7: memref<1x128xf32, #tpu.memory_space<vmem>>, %arg8: memref<1x4x128xf32, #tpu.memory_space<vmem>>) attributes {dimension_semantics = [#tpu.dimension_semantics<parallel>], iteration_bounds = array<i64: 2>, scalar_prefetch = 0 : i64, scratch_operands = 0 : i64, tpu.core_type = #tpu.core_type<tc>, window_params = [{transform_indices = @transform_0, window_bounds = array<i64: 4, 16, 4>}, {pipeline_mode = #tpu.pipeline_mode<synchronous>, transform_indices = @transform_1, window_bounds = array<i64: 3, 4, 8>}, {pipeline_mode = #tpu.pipeline_mode<synchronous>, transform_indices = @transform_2, window_bounds = array<i64: 1, 1, 8>}, {pipeline_mode = #tpu.pipeline_mode<synchronous>, transform_indices = @transform_3, window_bounds = array<i64: 8, 1024>}, {pipeline_mode = #tpu.pipeline_mode<synchronous>, transform_indices = @transform_4, window_bounds = array<i64: 1, 1024>}, {pipeline_mode = #tpu.pipeline_mode<synchronous>, transform_indices = @transform_5, window_bounds = array<i64: 1024, 128>}, {pipeline_mode = #tpu.pipeline_mode<synchronous>, transform_indices = @transform_6, window_bounds = array<i64: 1, 128>}, {transform_indices = @transform_7, window_bounds = array<i64: 1, 4, 128>}]} {
    %c0 = arith.constant 0 : index
    %c0_0 = arith.constant 0 : index
    %c0_1 = arith.constant 0 : index
    %0 = vector.load %arg1[%c0, %c0_0, %c0_1] : memref<4x16x4xf32, #tpu.memory_space<vmem>>, vector<4x16x4xf32>
    %1 = vector.shape_cast %0 : vector<4x16x4xf32> to vector<64x4xf32>
    %cst = arith.constant 0.000000e+00 : f32
    %2 = vector.broadcast %cst : f32 to vector<4x18x8xf32>
    %c0_2 = arith.constant 0 : index
    %c0_3 = arith.constant 0 : index
    %c0_4 = arith.constant 0 : index
    %3 = vector.load %arg2[%c0_2, %c0_3, %c0_4] : memref<3x4x8xf32, #tpu.memory_space<vmem>>, vector<1x4x8xf32>
    %4 = vector.shape_cast %3 : vector<1x4x8xf32> to vector<4x8xf32>
    %cst_5 = arith.constant dense<0.000000e+00> : vector<64x8xf32>
    %5 = tpu.matmul %1, %4, %cst_5 {dimension_numbers = #tpu.dot_dimension_numbers<[1], [0], [0], [1], [0, 0, 1, 1], [], []>} : vector<64x4xf32>, vector<4x8xf32>, vector<64x8xf32> -> vector<64x8xf32>
    %6 = vector.shape_cast %5 : vector<64x8xf32> to vector<4x16x8xf32>
    %cst_6 = arith.constant 0.000000e+00 : f32
    %7 = vector.broadcast %cst_6 : f32 to vector<4x2x8xf32>
    %8 = tpu.concatenate %7, %6 in 1 : vector<4x2x8xf32>, vector<4x16x8xf32> -> vector<4x18x8xf32>
    %9 = arith.addf %2, %8 : vector<4x18x8xf32>
    %c1 = arith.constant 1 : index
    %c0_7 = arith.constant 0 : index
    %c0_8 = arith.constant 0 : index
    %10 = vector.load %arg2[%c1, %c0_7, %c0_8] : memref<3x4x8xf32, #tpu.memory_space<vmem>>, vector<1x4x8xf32>
    %11 = vector.shape_cast %10 : vector<1x4x8xf32> to vector<4x8xf32>
    %cst_9 = arith.constant dense<0.000000e+00> : vector<64x8xf32>
    %12 = tpu.matmul %1, %11, %cst_9 {dimension_numbers = #tpu.dot_dimension_numbers<[1], [0], [0], [1], [0, 0, 1, 1], [], []>} : vector<64x4xf32>, vector<4x8xf32>, vector<64x8xf32> -> vector<64x8xf32>
    %13 = vector.shape_cast %12 : vector<64x8xf32> to vector<4x16x8xf32>
    %cst_10 = arith.constant 0.000000e+00 : f32
    %14 = vector.broadcast %cst_10 : f32 to vector<4x1x8xf32>
    %cst_11 = arith.constant 0.000000e+00 : f32
    %15 = vector.broadcast %cst_11 : f32 to vector<4x1x8xf32>
    %16 = tpu.concatenate %14, %13, %15 in 1 : vector<4x1x8xf32>, vector<4x16x8xf32>, vector<4x1x8xf32> -> vector<4x18x8xf32>
    %17 = arith.addf %9, %16 : vector<4x18x8xf32>
    %c2 = arith.constant 2 : index
    %c0_12 = arith.constant 0 : index
    %c0_13 = arith.constant 0 : index
    %18 = vector.load %arg2[%c2, %c0_12, %c0_13] : memref<3x4x8xf32, #tpu.memory_space<vmem>>, vector<1x4x8xf32>
    %19 = vector.shape_cast %18 : vector<1x4x8xf32> to vector<4x8xf32>
    %cst_14 = arith.constant dense<0.000000e+00> : vector<64x8xf32>
    %20 = tpu.matmul %1, %19, %cst_14 {dimension_numbers = #tpu.dot_dimension_numbers<[1], [0], [0], [1], [0, 0, 1, 1], [], []>} : vector<64x4xf32>, vector<4x8xf32>, vector<64x8xf32> -> vector<64x8xf32>
    %21 = vector.shape_cast %20 : vector<64x8xf32> to vector<4x16x8xf32>
    %cst_15 = arith.constant 0.000000e+00 : f32
    %22 = vector.broadcast %cst_15 : f32 to vector<4x2x8xf32>
    %23 = tpu.concatenate %21, %22 in 1 : vector<4x16x8xf32>, vector<4x2x8xf32> -> vector<4x18x8xf32>
    %24 = arith.addf %17, %23 : vector<4x18x8xf32>
    %c0_16 = arith.constant 0 : index
    %c0_17 = arith.constant 0 : index
    %c0_18 = arith.constant 0 : index
    %25 = vector.load %arg3[%c0_16, %c0_17, %c0_18] : memref<1x1x8xf32, #tpu.memory_space<vmem>>, vector<1x1x8xf32>
    %26 = vector.broadcast %25 : vector<1x1x8xf32> to vector<4x18x8xf32>
    %27 = arith.addf %24, %26 : vector<4x18x8xf32>
    %cst_19 = arith.constant 0.000000e+00 : f32
    %28 = vector.broadcast %cst_19 : f32 to vector<4x18x8xf32>
    %29 = arith.maximumf %27, %28 : vector<4x18x8xf32>
    %30 = tpu.iota {dimensions = array<i32: 1>} : vector<1x18x1xi32>
    %c18_i32 = arith.constant 18 : i32
    %31 = vector.broadcast %c18_i32 : i32 to vector<1x18x1xi32>
    %32 = arith.cmpi slt, %30, %31 : vector<1x18x1xi32>
    %33 = arith.extui %32 : vector<1x18x1xi1> to vector<1x18x1xi32>
    %34 = arith.sitofp %33 : vector<1x18x1xi32> to vector<1x18x1xf32>
    %cst_20 = arith.constant 0.055555556 : f32
    %35 = vector.broadcast %cst_20 : f32 to vector<1x18x1xf32>
    %36 = arith.mulf %34, %35 : vector<1x18x1xf32>
    %37 = vector.broadcast %36 : vector<1x18x1xf32> to vector<4x18x8xf32>
    %38 = arith.mulf %29, %37 : vector<4x18x8xf32>
    %cst_21 = arith.constant dense<0.000000e+00> : vector<4x8xf32>
    %39 = vector.multi_reduction <add>, %38, %cst_21 [1] : vector<4x18x8xf32> to vector<4x8xf32>
    %c0_22 = arith.constant 0 : index
    %c0_23 = arith.constant 0 : index
    %40 = vector.load %arg4[%c0_22, %c0_23] : memref<8x1024xf32, #tpu.memory_space<vmem>>, vector<8x1024xf32>
    %cst_24 = arith.constant dense<0.000000e+00> : vector<4x1024xf32>
    %41 = tpu.matmul %39, %40, %cst_24 {dimension_numbers = #tpu.dot_dimension_numbers<[1], [0], [0], [1], [0, 0, 1, 1], [], []>} : vector<4x8xf32>, vector<8x1024xf32>, vector<4x1024xf32> -> vector<4x1024xf32>
    %c0_25 = arith.constant 0 : index
    %c0_26 = arith.constant 0 : index
    %42 = vector.load %arg5[%c0_25, %c0_26] : memref<1x1024xf32, #tpu.memory_space<vmem>>, vector<1x1024xf32>
    %43 = vector.broadcast %42 : vector<1x1024xf32> to vector<4x1024xf32>
    %44 = arith.addf %41, %43 : vector<4x1024xf32>
    %cst_27 = arith.constant 0.000000e+00 : f32
    %45 = vector.broadcast %cst_27 : f32 to vector<4x1024xf32>
    %46 = arith.maximumf %44, %45 : vector<4x1024xf32>
    %c0_28 = arith.constant 0 : index
    %c0_29 = arith.constant 0 : index
    %47 = vector.load %arg6[%c0_28, %c0_29] : memref<1024x128xf32, #tpu.memory_space<vmem>>, vector<1024x128xf32>
    %cst_30 = arith.constant dense<0.000000e+00> : vector<4x128xf32>
    %48 = tpu.matmul %46, %47, %cst_30 {dimension_numbers = #tpu.dot_dimension_numbers<[1], [0], [0], [1], [0, 0, 1, 1], [], []>} : vector<4x1024xf32>, vector<1024x128xf32>, vector<4x128xf32> -> vector<4x128xf32>
    %c0_31 = arith.constant 0 : index
    %c0_32 = arith.constant 0 : index
    %49 = vector.load %arg7[%c0_31, %c0_32] : memref<1x128xf32, #tpu.memory_space<vmem>>, vector<1x128xf32>
    %50 = vector.broadcast %49 : vector<1x128xf32> to vector<4x128xf32>
    %51 = arith.addf %48, %50 : vector<4x128xf32>
    %cst_33 = arith.constant dense<0xFF800000> : vector<4xf32>
    %52 = vector.multi_reduction <maximumf>, %51, %cst_33 [1] : vector<4x128xf32> to vector<4xf32>
    %53 = vector.shape_cast %52 : vector<4xf32> to vector<4x1xf32>
    %54 = vector.broadcast %53 : vector<4x1xf32> to vector<4x128xf32>
    %55 = arith.subf %51, %54 : vector<4x128xf32>
    %56 = math.exp %55 : vector<4x128xf32>
    %cst_34 = arith.constant dense<0.000000e+00> : vector<4xf32>
    %57 = vector.multi_reduction <add>, %56, %cst_34 [1] : vector<4x128xf32> to vector<4xf32>
    %58 = vector.shape_cast %57 : vector<4xf32> to vector<4x1xf32>
    %59 = math.log %58 : vector<4x1xf32>
    %60 = vector.broadcast %59 : vector<4x1xf32> to vector<4x128xf32>
    %61 = arith.subf %55, %60 : vector<4x128xf32>
    %c0_35 = arith.constant 0 : index
    %c0_36 = arith.constant 0 : index
    %c0_37 = arith.constant 0 : index
    %62 = vector.load %arg8[%c0_35, %c0_36, %c0_37] : memref<1x4x128xf32, #tpu.memory_space<vmem>>, vector<1x4x128xf32>
    %63 = vector.shape_cast %62 : vector<1x4x128xf32> to vector<4x128xf32>
    %64 = vector.shape_cast %61 : vector<4x128xf32> to vector<1x4x128xf32>
    tpu.vector_store %arg8[%c0_35, %c0_36, %c0_37], %64 {strides = array<i32>} : memref<1x4x128xf32, #tpu.memory_space<vmem>>, vector<1x4x128xf32>,
    return
  }
  func.func @transform_0(%arg0: i32) -> (i32, i32, i32) {
    %c0_i32 = arith.constant 0 : i32
    %c0_i32_0 = arith.constant 0 : i32
    %c0_i32_1 = arith.constant 0 : i32
    return %arg0, %c0_i32, %c0_i32_0 : i32, i32, i32
  }
  func.func @transform_1(%arg0: i32) -> (i32, i32, i32) {
    %c0_i32 = arith.constant 0 : i32
    %c0_i32_0 = arith.constant 0 : i32
    %c0_i32_1 = arith.constant 0 : i32
    %c0_i32_2 = arith.constant 0 : i32
    return %c0_i32, %c0_i32_0, %c0_i32_1 : i32, i32, i32
  }
  func.func @transform_2(%arg0: i32) -> (i32, i32, i32) {
    %c0_i32 = arith.constant 0 : i32
    %c0_i32_0 = arith.constant 0 : i32
    %c0_i32_1 = arith.constant 0 : i32
    %c0_i32_2 = arith.constant 0 : i32
    return %c0_i32, %c0_i32_0, %c0_i32_1 : i32, i32, i32
  }
  func.func @transform_3(%arg0: i32) -> (i32, i32) {
    %c0_i32 = arith.constant 0 : i32
    %c0_i32_0 = arith.constant 0 : i32
    %c0_i32_1 = arith.constant 0 : i32
    return %c0_i32, %c0_i32_0 : i32, i32
  }
  func.func @transform_4(%arg0: i32) -> (i32, i32) {
    %c0_i32 = arith.constant 0 : i32
    %c0_i32_0 = arith.constant 0 : i32
    %c0_i32_1 = arith.constant 0 : i32
    return %c0_i32, %c0_i32_0 : i32, i32
  }
  func.func @transform_5(%arg0: i32) -> (i32, i32) {
    %c0_i32 = arith.constant 0 : i32
    %c0_i32_0 = arith.constant 0 : i32
    %c0_i32_1 = arith.constant 0 : i32
    return %c0_i32, %c0_i32_0 : i32, i32
  }
  func.func @transform_6(%arg0: i32) -> (i32, i32) {
    %c0_i32 = arith.constant 0 : i32
    %c0_i32_0 = arith.constant 0 : i32
    %c0_i32_1 = arith.constant 0 : i32
    return %c0_i32, %c0_i32_0 : i32, i32
  }
  func.func @transform_7(%arg0: i32) -> (i32, i32, i32) {
    %c0_i32 = arith.constant 0 : i32
    %c0_i32_0 = arith.constant 0 : i32
    %c0_i32_1 = arith.constant 0 : i32
    return %arg0, %c0_i32, %c0_i32_0 : i32, i32, i32
  }
}

</mosaic_0001>

<bundles_post_ra>
// kernel: keyword_cnn2d_forward.1
= control target key start
LH: loop header
LB: loop body
LE: loop exit
PB: predicated region body
PF: predicated region fallthrough
CT: control target
= control target key end

     0   :  { %12 = vsyncpa [#allocation3], 0  ;;  %s2070_s0 = inlined_call_operand.vmem [shape: f32[8,16,4], index: 0, kind: input, shape index: {}]   ;;  %s2071_s1 = inlined_call_operand.vmem [shape: f32[3,4,8], index: 1, kind: input, shape index: {}]   ;;  %s2072_s2 = inlined_call_operand.vmem [shape: f32[1,1,8], index: 2, kind: input, shape index: {}]   ;;  %s2073_s3 = inlined_call_operand.vmem [shape: f32[8,1024], index: 3, kind: input, shape index: {}]   ;;  %s2074_s4 = inlined_call_operand.vmem [shape: f32[1,1024], index: 4, kind: input, shape index: {}]   ;;  %s2075_s5 = inlined_call_operand.vmem [shape: f32[1024,128], index: 5, kind: input, shape index: {}]   ;;  %s2076_s6 = inlined_call_operand.vmem [shape: f32[1,128], index: 6, kind: input, shape index: {}]   ;;  %s2077_s7 = inlined_call_operand.hbm [shape: f32[2,4,128], index: 7, kind: output, shape index: {}]  }
   0x1   :  { %14 = vsyncpa [#allocation3 + $0x1], 0  ;;  %s1457_s24 = smov 0   ;;  %s1459_s25 = smov 0  }
   0x2   :  { %s1461_s26 = smov 0   ;;  %s1463_s27 = smov 0  }
   0x3 LB: > { %s1254_s28 = sadd.s32 4294967295, %s1414_s27   ;;  %s1255_s29 = sadd.s32 4294967294, %s1414_s27   ;;  %s1414_s27 = sphi %s1463_s27, %s2083_s27   ;;  %s1410_s26 = sphi %s1461_s26, %s2082_s26   ;;  %s1406_s25 = sphi %s1459_s25, %s2081_s25   ;;  %s1402_s24 = sphi %s1457_s24, %s2080_s24  }
   0x4   : > { %s1480_s30 = sadd.s32 1, %s1414_s27   ;;  %s179_s8 = sadd.s32 1, %s1410_s26 }
   0x5   : > { %s176_s9 = ssub.s32 %s1414_s27, %s1480_s30  ;;  %p189_p0 = scmp.ne.s32.totalorder %s1410_s26, %s1406_s25 }
   0x6   : > { %p177_p1 = scmp.eq.s32.totalorder %s176_s9, 0  ;;  %p190_p2 = scmp.eq.s32.totalorder %s1254_s28, 1 }
   0x7   : > { %p195_p3 = scmp.ne.s32.totalorder %s1406_s25, %s1402_s24  ;;  %p196_p4 = scmp.eq.s32.totalorder %s1255_s29, 1 }
   0x8   : > { %s1490_s10 = scalar_select %p177_p1, %s1410_s26, %s179_s8  }
   0x9   : > { %p1492_p5 = por %p190_p2, %p189_p0  ;;  %p1496_p6 = por %p196_p4, %p195_p3 }
   0xa   : > { %p1258_p7 = scmp.ge.s32.totalorder %s1414_s27, 1  ;;  %p242_p8 = scmp.lt.s32.totalorder %s1414_s27, 3 }
   0xc   : > { %p243_p9 = pnand %p1258_p7, %p242_p8 }
   0xd   : > { %s1508_s17 = sshll.u32 (!%p243_p9), %s1254_s28, 2  ;;  %s272_s23 = sand.u32 (!%p243_p9), 1, %s1406_s25  }
   0xe   : > { %246 = sbr.rel (%p243_p9) target bundleno = 824 (0x338), region = 48  ;;  %p276_p10 = scmp.lt.s32.totalorder (!%p243_p9), %s1508_s17, 7 }
   0xf   : > { %s1191_s9 = scalar_lea.hbm (!%p243_p9), %s2077_s7, %s1508_s17  ;;  %s1181_s16 = scalar_lea.sflag (!%p243_p9), [#allocation3], %s272_s23 }
  0x10   : > { %s1195_s15 = sshll.u32 (!%p243_p9), %s1191_s9, 4  ;;  %s1196_s15 = int_to_ptr.hbm [resolvable:$true] %s1195_s15 }
  0x11   : > { %s1366_s18 = sshra.s32 (!%p243_p9), %s1196_s15, 4  ;;  %s1367_s18 = int_to_ptr.hbm [resolvable:$true] %s1366_s18 }
  0x12   : > { %s1368_s19 = scalar_lea.hbm (!%p243_p9), %s1367_s18, 4  ;;  %p1373_p0 = scmp.lt.s32.totalorder (!%p243_p9), %s1367_s18, %s2077_s7 }
  0x13   : > { %v290_v0 = vld [vmem:[%s2071_s1] sm:$0xf]  ;;  %vm316_vm0 = vcmask 1043456   ;;  %v1272_v1 = vld [vmem:[%s2071_s1 + $0x4] sm:$0xf]  ;;  %s277_s20 = scalar_select %p276_p10, %s1508_s17, 7  ;;  %v595_v34 = vlaneseq }
  0x14   : > { %1263 = vmatpush.msk.msra.mxu0 %vm316_vm0, %v290_v0  ;;  %1273 = vmatpush.msk.msra.mxu1 %vm316_vm0, %v1272_v1  ;;  %v1282_v2 = vld [vmem:[%s2071_s1 + $0x8] sm:$0xf]  ;;  %vm291_vm1 = vcmask 31744   ;;  %vm369_vm2 = vcmask 1041408   ;;  %vm464_vm3 = vcmask 1040384   ;;  %vm623_vm5 = vcmask 64512   ;;  %p1369_p11 = scmp.ne.s32.totalorder %s1367_s18, %s1368_s19 }
  0x15   : > { %1283 = vmatpush.msk.msra.mxu2 %vm316_vm0, %v1282_v2  ;;  %s1305_s21 = sshll.u32 %s277_s20, 4  ;;  %v596_v48 = vshrl.u32 %v595_v34, 7  ;;  %v1558_v54 = vld [vmem:[%s2072_s2] ss:$0 sm:$0xff]  ;;  %vm627_vm6 = vcmask 58368   ;;  %vm699_vm7 = vcmask 1041409  }
  0x16   : > { %s280_s28 = scalar_lea.vmem %s2070_s0, %s1305_s21  ;;  %vm701_vm8 = vcmask 1042434   ;;  %vm703_vm9 = vcmask 1043459   ;;  %p1370_p12 = pnand %p1369_p11, %p1492_p5 }
  0x17   : > { %v282_v3 = vld [vmem:[%s280_s28] sm:$0xff]  ;;  %v283_v4 = vld [vmem:[%s280_s28 + $0x8] sm:$0xff]  ;;  %v284_v5 = vld [vmem:[%s280_s28 + $0x10] sm:$0xff]  ;;  %v598_v57 = vadd.s32 16, %v596_v48  ;;  %s1372_s17 = scalar_lea.hbm %s2077_s7, 8 }
  0x18   : > { %1264 = vmatmul.msk.f32.vlgmr.msra.gmra.mxu0 %vm291_vm1, %v282_v3  ;;  %1274 = vmatmul.msk.f32.vlgmr.msra.gmra.mxu1 %vm291_vm1, %v282_v3  ;;  %v285_v6 = vld [vmem:[%s280_s28 + $0x18] sm:$0xff]  ;;  %v286_v7 = vld [vmem:[%s280_s28 + $0x20] sm:$0xff]  ;;  %v287_v8 = vld [vmem:[%s280_s28 + $0x28] sm:$0xff]  ;;  %p1371_p13 = pneg %p1370_p12  ;;  %p1374_p1 = scmp.lt.s32.totalorder %s1372_s17, %s1368_s19 }
  0x19   : > { %1284 = vmatmul.msk.f32.vlgmr.msra.gmra.mxu2 %vm291_vm1, %v282_v3  ;;  %v288_v9 = vld [vmem:[%s280_s28 + $0x30] sm:$0xff]  ;;  %v289_v10 = vld [vmem:[%s280_s28 + $0x38] sm:$0xff]  ;;  %vm601_vm4 = vcmp.lt.s32.totalorder %v598_v57, 18  ;;  %s1259_s28 = sshll.u32 %s272_s23, 2 }
  0x1a   : > { %s274_s13 = scalar_lea.vmem [#allocation2], %s1259_s28  ;;  %p1375_p2 = por %p1374_p1, %p1373_p0 }
  0x1b   : > { %s1193_s14 = sshll.u32 %s274_s13, 4  ;;  %s1194_s14 = int_to_ptr.vmem [resolvable:$true] %s1193_s14 }
  0x1c   : > { %p1376_p3 = pnand %p1375_p2, %p1371_p13 }
  0x20   : > { %1265 = vmatmul.msk.f32.gmra.mxu0 %vm291_vm1, %v283_v4  ;;  %1275 = vmatmul.msk.f32.gmra.mxu1 %vm291_vm1, %v283_v4 }
  0x21   : > { %1285 = vmatmul.msk.f32.gmra.mxu2 %vm291_vm1, %v283_v4 }
  0x28   : > { %1266 = vmatmul.msk.f32.gmra.mxu0 %vm291_vm1, %v284_v5  ;;  %1276 = vmatmul.msk.f32.gmra.mxu1 %vm291_vm1, %v284_v5 }
  0x29   : > { %1286 = vmatmul.msk.f32.gmra.mxu2 %vm291_vm1, %v284_v5 }
  0x30   : > { %1267 = vmatmul.msk.f32.gmra.mxu0 %vm291_vm1, %v285_v6  ;;  %1277 = vmatmul.msk.f32.gmra.mxu1 %vm291_vm1, %v285_v6 }
  0x31   : > { %1287 = vmatmul.msk.f32.gmra.mxu2 %vm291_vm1, %v285_v6 }
  0x38   : > { %1268 = vmatmul.msk.f32.gmra.mxu0 %vm291_vm1, %v286_v7  ;;  %1278 = vmatmul.msk.f32.gmra.mxu1 %vm291_vm1, %v286_v7 }
  0x39   : > { %1288 = vmatmul.msk.f32.gmra.mxu2 %vm291_vm1, %v286_v7 }
  0x40   : > { %1269 = vmatmul.msk.f32.gmra.mxu0 %vm291_vm1, %v287_v8  ;;  %1279 = vmatmul.msk.f32.gmra.mxu1 %vm291_vm1, %v287_v8 }
  0x41   : > { %1289 = vmatmul.msk.f32.gmra.mxu2 %vm291_vm1, %v287_v8 }
  0x48   : > { %1270 = vmatmul.msk.f32.gmra.mxu0 %vm291_vm1, %v288_v9  ;;  %1280 = vmatmul.msk.f32.gmra.mxu1 %vm291_vm1, %v288_v9 }
  0x49   : > { %1290 = vmatmul.msk.f32.gmra.mxu2 %vm291_vm1, %v288_v9 }
  0x50   : > { %1271 = vmatmul.msk.f32.gmra.mxu0 %vm291_vm1, %v289_v10  ;;  %1281 = vmatmul.msk.f32.gmra.mxu1 %vm291_vm1, %v289_v10 }
  0x51   : > { %1291 = vmatmul.msk.f32.gmra.mxu2 %vm291_vm1, %v289_v10 }
  0x95   : > { %v337_v11 = vpop.f32.mrf.mxu0  ;;  %v432_v12 = vpop.f32.mrf.mxu1 }
  0x96   : > { %v370_v28 = vrot.slane %v337_v11, 6  ;;  %v465_v29 = vrot.slane %v432_v12, 7 }
  0x98   : > { %v394_v37 = vsel %vm369_vm2, 0.0, %v370_v28  ;;  %v489_v38 = vsel %vm464_vm3, 0.0, %v465_v29 }
  0x99   : > { %v497_v47 = vadd.f32 %v489_v38, %v394_v37 }
  0x9c   : > { %v531_v13 = vpop.f32.mrf.mxu2 }
  0x9d   : > { %v340_v14 = vpop.f32.mrf.mxu0  ;;  %v435_v15 = vpop.f32.mrf.mxu1  ;;  %v555_v56 = vadd.f32 %v531_v13, %v497_v47 }
  0x9e   : > { %v371_v22 = vrot.slane %v340_v14, 6  ;;  %v466_v23 = vrot.slane %v435_v15, 7 }
  0x9f   : > { %v571_v6 = vadd.f32 %v1558_v54, %v555_v56 }
  0xa0   : > { %v372_v32 = vsel %vm369_vm2, %v370_v28, %v371_v22  ;;  %v467_v33 = vsel %vm464_vm3, %v465_v29, %v466_v23  ;;  %v493_v59 = vsel %vm464_vm3, %v466_v23, 0.0 }
  0xa1   : > { %v498_v41 = vadd.f32 %v467_v33, %v372_v32  ;;  %v499_v7 = vadd.f32 %v493_v59, %v371_v22 }
  0xa4   : > { %v534_v16 = vpop.f32.mrf.mxu2 }
  0xa5   : > { %v343_v17 = vpop.f32.mrf.mxu0  ;;  %v438_v18 = vpop.f32.mrf.mxu1  ;;  %v556_v52 = vadd.f32 %v534_v16, %v498_v41 }
  0xa6   : > { %v373_v26 = vrot.slane %v343_v17, 6  ;;  %v468_v27 = vrot.slane %v438_v18, 7  ;;  %v583_v18 = vmax.f32 %v571_v6, 0.0 }
  0xa7   : > { %v572_v62 = vadd.f32 %v1558_v54, %v556_v52 }
  0xa8   : > { %v395_v35 = vsel %vm369_vm2, 0.0, %v373_v26  ;;  %v490_v36 = vsel %vm464_vm3, 0.0, %v468_v27  ;;  %v611_v34 = vmul.f32 0.055555556, %v583_v18 }
  0xa9   : > { %v500_v44 = vadd.f32 %v490_v36, %v395_v35  ;;  %v584_v12 = vmax.f32 %v572_v62, 0.0 }
  0xac   : > { %v537_v19 = vpop.f32.mrf.mxu2 }
  0xad   : > { %v346_v20 = vpop.f32.mrf.mxu0  ;;  %v441_v21 = vpop.f32.mrf.mxu1  ;;  %v558_v55 = vadd.f32 %v537_v19, %v500_v44  ;;  %v573_v19 = vadd.f32 %v1558_v54, %v499_v7 }
  0xae   : > { %v374_v24 = vrot.slane %v346_v20, 6  ;;  %v469_v25 = vrot.slane %v441_v21, 7  ;;  %v1416_v20 = vmov 0.0  }
  0xaf   : > { %v574_v2 = vadd.f32 %v1558_v54, %v558_v55  ;;  %v1292_v21 = vsel %vm601_vm4, 1.0, %v1416_v20  ;;  %v585_v35 = vmax.f32 %v573_v19, 0.0  ;;  %v669_v55 = vld [vmem:[%s2073_s3] sm:$0xff] }
  0xb0   : > { %v375_v30 = vsel %vm369_vm2, %v373_v26, %v374_v24  ;;  %v470_v31 = vsel %vm464_vm3, %v468_v27, %v469_v25  ;;  %v494_v58 = vsel %vm464_vm3, %v469_v25, 0.0  ;;  %v612_v25 = vmul.f32 0.055555556, %v584_v12  ;;  %722 = vmatpush.msra.mxu3 %v669_v55  ;;  %v671_v55 = vld [vmem:[%s2073_s3 + $0x10] sm:$0xff] }
  0xb1   : > { %v501_v39 = vadd.f32 %v470_v31, %v375_v30  ;;  %v502_v3 = vadd.f32 %v494_v58, %v374_v24  ;;  %v586_v16 = vmax.f32 %v574_v2, 0.0  ;;  %v610_v36 = vmul.f32 0.055555556, %v1292_v21 }
  0xb3   : > { %v576_v17 = vadd.f32 %v1558_v54, %v502_v3  ;;  %v614_v30 = vmul.f32 0.055555556, %v586_v16  ;;  %v613_v48 = vmul.f32 %v610_v36, %v585_v35 }
  0xb4   : > { %v540_v40 = vpop.f32.mrf.mxu2 }
  0xb5   : > { %v349_v42 = vpop.f32.mrf.mxu0  ;;  %v444_v43 = vpop.f32.mrf.mxu1  ;;  %v559_v49 = vadd.f32 %v540_v40, %v501_v39  ;;  %v588_v31 = vmax.f32 %v576_v17, 0.0  ;;  %v628_v2 = vsel %vm627_vm6, %v613_v48, 0.0 }
  0xb6   : > { %v376_v45 = vrot.slane %v349_v42, 6  ;;  %v471_v46 = vrot.slane %v444_v43, 7 }
  0xb7   : > { %v575_v60 = vadd.f32 %v1558_v54, %v559_v49  ;;  %v616_v47 = vmul.f32 %v610_v36, %v588_v31 }
  0xb8   : > { %v396_v50 = vsel %vm369_vm2, 0.0, %v376_v45  ;;  %v491_v51 = vsel %vm464_vm3, 0.0, %v471_v46 }
  0xb9   : > { %v503_v53 = vadd.f32 %v491_v51, %v396_v50  ;;  %v587_v8 = vmax.f32 %v575_v60, 0.0  ;;  %v624_v51 = vsel %vm623_vm5, %v611_v34, 0.0  ;;  %v639_v62 = vsel %vm627_vm6, %v616_v47, 0.0 }
  0xbb   : > { %v615_v22 = vmul.f32 0.055555556, %v587_v8 }
  0xbc   : > { %v543_v61 = vpop.f32.mrf.mxu2 }
  0xbd   : > { %v561_v63 = vadd.f32 %v543_v61, %v503_v53  ;;  %v352_v0 = vpop.f32.mrf.mxu0  ;;  %v447_v1 = vpop.f32.mrf.mxu1  ;;  %v637_v38 = vsel %vm623_vm5, %v615_v22, 0.0 }
  0xbe   : > { %v377_v4 = vrot.slane %v352_v0, 6  ;;  %v472_v5 = vrot.slane %v447_v1, 7 }
  0xbf   : > { %v577_v13 = vadd.f32 %v1558_v54, %v561_v63 }
  0xc0   : > { %v495_v9 = vsel %vm464_vm3, %v472_v5, 0.0  ;;  %v378_v10 = vsel %vm369_vm2, %v376_v45, %v377_v4  ;;  %v473_v11 = vsel %vm464_vm3, %v471_v46, %v472_v5  ;;  %v625_v45 = vsel %vm623_vm5, %v612_v25, 0.0 }
  0xc1   : > { %v505_v14 = vadd.f32 %v495_v9, %v377_v4  ;;  %v504_v15 = vadd.f32 %v473_v11, %v378_v10  ;;  %v589_v26 = vmax.f32 %v577_v13, 0.0  ;;  %v636_v46 = vsel %vm623_vm5, %v614_v30, 0.0  ;;  %v670_v4 = vld [vmem:[%s2073_s3 + $0x8] sm:$0xff] }
  0xc2   : > { %v638_v49 = vadd.f32 %v637_v38, %v636_v46  ;;  %v626_v56 = vadd.f32 %v625_v45, %v624_v51  ;;  %742 = vmatpush.msrb.mxu3 %v670_v4  ;;  %v903_v4 = vld [vmem:[%s2075_s5 + $0xe0] sm:$0xff] }
  0xc3   : > { %v579_v23 = vadd.f32 %v1558_v54, %v505_v14  ;;  %v617_v42 = vmul.f32 0.055555556, %v589_v26 }
  0xc4   : > { %v546_v24 = vpop.f32.mrf.mxu2  ;;  %v640_v3 = vadd.f32 %v639_v62, %v638_v49  ;;  %v629_v13 = vadd.f32 %v628_v2, %v626_v56  ;;  %v906_v62 = vld [vmem:[%s2075_s5 + $0xf8] sm:$0xff] }
  0xc5   : > { %v562_v27 = vadd.f32 %v546_v24, %v504_v15  ;;  %v355_v28 = vpop.f32.mrf.mxu0  ;;  %v450_v29 = vpop.f32.mrf.mxu1  ;;  %v591_v39 = vmax.f32 %v579_v23, 0.0  ;;  %v647_v57 = vsel %vm623_vm5, %v617_v42, 0.0  ;;  %1027 = vmatpush.msrb.mxu1 %v906_v62  ;;  %v922_v2 = vld [vmem:[%s2075_s5 + $0x178] sm:$0xff]  ;;  %v908_v62 = vld [vmem:[%s2075_s5 + $0x108] sm:$0xff] }
  0xc6   : > { %v379_v32 = vrot.slane %v355_v28, 6  ;;  %v474_v33 = vrot.slane %v450_v29, 7  ;;  %v641_v15 = vrot.slane %v640_v3, 4  ;;  %v630_v20 = vrot.slane %v629_v13, 4  ;;  %1047 = vmatpush.msrb.mxu2 %v922_v2  ;;  %v907_v2 = vld [vmem:[%s2075_s5 + $0x100] sm:$0xff] }
  0xc7   : > { %v578_v37 = vadd.f32 %v1558_v54, %v562_v27  ;;  %v619_v52 = vmul.f32 %v610_v36, %v591_v39 }
  0xc8   : > { %v397_v40 = vsel %vm369_vm2, 0.0, %v379_v32  ;;  %v492_v41 = vsel %vm464_vm3, 0.0, %v474_v33  ;;  %v642_v23 = vadd.f32 %v641_v15, %v640_v3  ;;  %v631_v27 = vadd.f32 %v630_v20, %v629_v13  ;;  %v887_v3 = vld [vmem:[%s2075_s5 + $0x60] sm:$0xff]  ;;  %v884_v13 = vld [vmem:[%s2075_s5 + $0x48] sm:$0xff]  ;;  %v918_v15 = vld [vmem:[%s2075_s5 + $0x158] sm:$0xff] }
  0xc9   : > { %v590_v43 = vmax.f32 %v578_v37, 0.0  ;;  %v506_v44 = vadd.f32 %v492_v41, %v397_v40  ;;  %v650_v5 = vsel %vm627_vm6, %v619_v52, 0.0  ;;  %v898_v20 = vld [vmem:[%s2075_s5 + $0xb8] sm:$0xff] }
  0xca   : > { %v643_v30 = vrot.slane %v642_v23, 2  ;;  %v632_v34 = vrot.slane %v631_v27, 2 }
  0xcb   : > { %v618_v50 = vmul.f32 0.055555556, %v590_v43 }
  0xcc   : > { %v549_v53 = vpop.f32.mrf.mxu2  ;;  %v644_v38 = vadd.f32 %v643_v30, %v642_v23  ;;  %v633_v40 = vadd.f32 %v632_v34, %v631_v27  ;;  %v879_v23 = vld [vmem:[%s2075_s5 + $0x20] sm:$0xff]  ;;  %v897_v27 = vld [vmem:[%s2075_s5 + $0xb0] sm:$0xff]  ;;  %v876_v30 = vld [vmem:[%s2075_s5 + $0x8] sm:$0xff] }
  0xcd   : > { %v648_v58 = vsel %vm623_vm5, %v618_v50, 0.0  ;;  %v564_v59 = vadd.f32 %v549_v53, %v506_v44  ;;  %v358_v60 = vpop.f32.mrf.mxu0  ;;  %v453_v61 = vpop.f32.mrf.mxu1  ;;  %v875_v34 = vld [vmem:[%s2075_s5] sm:$0xff] }
  0xce   : > { %v649_v63 = vadd.f32 %v648_v58, %v647_v57  ;;  %v380_v0 = vrot.slane %v358_v60, 6  ;;  %v475_v1 = vrot.slane %v453_v61, 7  ;;  %v645_v42 = vrot.slane %v644_v38, 1  ;;  %v672_v57 = vld [vmem:[%s2073_s3 + $0x18] sm:$0xff]  ;;  %v673_v58 = vld [vmem:[%s2073_s3 + $0x20] sm:$0xff]  ;;  %v889_v61 = vld [vmem:[%s2075_s5 + $0x70] sm:$0xff] }
  0xcf   : > { %v580_v10 = vadd.f32 %v1558_v54, %v564_v59  ;;  %v674_v59 = vld [vmem:[%s2073_s3 + $0x28] sm:$0xff]  ;;  %v890_v60 = vld [vmem:[%s2075_s5 + $0x78] sm:$0xff] }
  0xd0   : > { %v496_v6 = vsel %vm464_vm3, %v475_v1, 0.0  ;;  %v381_v7 = vsel %vm369_vm2, %v379_v32, %v380_v0  ;;  %v476_v8 = vsel %vm464_vm3, %v474_v33, %v475_v1  ;;  %v651_v9 = vadd.f32 %v650_v5, %v649_v63  ;;  %1007 = vmatpush.msrb.mxu0 %v890_v60  ;;  %v888_v63 = vld [vmem:[%s2075_s5 + $0x68] sm:$0xff]  ;;  %v921_v5 = vld [vmem:[%s2075_s5 + $0x170] sm:$0xff] }
  0xd1   : > { %v508_v11 = vadd.f32 %v496_v6, %v380_v0  ;;  %v507_v12 = vadd.f32 %v476_v8, %v381_v7  ;;  %v592_v18 = vmax.f32 %v580_v10, 0.0  ;;  %v646_v46 = vadd.f32 %v645_v42, %v644_v38  ;;  %v905_v0 = vld [vmem:[%s2075_s5 + $0xf0] sm:$0xff]  ;;  %v904_v1 = vld [vmem:[%s2075_s5 + $0xe8] sm:$0xff]  ;;  %v886_v7 = vld [vmem:[%s2075_s5 + $0x58] sm:$0xff]  ;;  %1048 = vmatpush.msrb.mxu2 %v921_v5 }
  0xd2   : > { %v652_v17 = vrot.slane %v651_v9, 4  ;;  %1008 = vmatpush.msrb.mxu0 %v889_v61  ;;  %1028 = vmatpush.msrb.mxu1 %v905_v0  ;;  %v675_v6 = vld [vmem:[%s2073_s3 + $0x30] sm:$0xff]  ;;  %v902_v8 = vld [vmem:[%s2075_s5 + $0xd8] sm:$0xff]  ;;  %v935_v38 = vld [vmem:[%s2075_s5 + $0x1e0] sm:$0xff] }
  0xd3   : > { %v582_v14 = vadd.f32 %v1558_v54, %v508_v11  ;;  %v620_v25 = vmul.f32 0.055555556, %v592_v18  ;;  %v885_v10 = vld [vmem:[%s2075_s5 + $0x50] sm:$0xff]  ;;  %v676_v18 = vld [vmem:[%s2073_s3 + $0x38] sm:$0xff]  ;;  %v948_v0 = vld [vmem:[%s2075_s5 + $0x248] sm:$0xff] }
  0xd4   : > { %v552_v16 = vpop.f32.mrf.mxu2  ;;  %v653_v24 = vadd.f32 %v652_v17, %v651_v9  ;;  %1009 = vmatpush.msrb.mxu0 %v888_v63  ;;  %1029 = vmatpush.msrb.mxu1 %v904_v1  ;;  %v920_v9 = vld [vmem:[%s2075_s5 + $0x168] sm:$0xff]  ;;  %v901_v11 = vld [vmem:[%s2075_s5 + $0xd0] sm:$0xff]  ;;  %v899_v17 = vld [vmem:[%s2075_s5 + $0xc0] sm:$0xff] }
  0xd5   : > { %v565_v19 = vadd.f32 %v552_v16, %v507_v12  ;;  %v594_v21 = vmax.f32 %v582_v14, 0.0  ;;  %v658_v32 = vsel %vm623_vm5, %v620_v25, 0.0  ;;  %v919_v12 = vld [vmem:[%s2075_s5 + $0x160] sm:$0xff]  ;;  %1049 = vmatpush.msrb.mxu2 %v920_v9  ;;  %v900_v14 = vld [vmem:[%s2075_s5 + $0xc8] sm:$0xff]  ;;  %v938_v25 = vld [vmem:[%s2075_s5 + $0x1f8] sm:$0xff] }
  0xd6   : > { %v654_v31 = vrot.slane %v653_v24, 2  ;;  %1010 = vmatpush.msrb.mxu0 %v887_v3  ;;  %1030 = vmatpush.msrb.mxu1 %v903_v4  ;;  %v883_v16 = vld [vmem:[%s2075_s5 + $0x40] sm:$0xff]  ;;  %v893_v42 = vld [vmem:[%s2075_s5 + $0x90] sm:$0xff]  ;;  %v928_v63 = vld [vmem:[%s2075_s5 + $0x1a8] sm:$0xff] }
  0xd7   : > { %v581_v22 = vadd.f32 %v1558_v54, %v565_v19  ;;  %v622_v28 = vmul.f32 %v610_v36, %v594_v21  ;;  %v634_v36 = vrot.slane %v633_v40, 1  ;;  %1050 = vmatpush.msrb.mxu2 %v919_v12  ;;  %v882_v19 = vld [vmem:[%s2075_s5 + $0x38] sm:$0xff]  ;;  %v881_v21 = vld [vmem:[%s2075_s5 + $0x30] sm:$0xff]  ;;  %v968_v1 = vld [vmem:[%s2075_s5 + $0x2e8] sm:$0xff] }
  0xd8   : > { %v655_v54 = vadd.f32 %v654_v31, %v653_v24  ;;  %1011 = vmatpush.msrb.mxu0 %v886_v7  ;;  %1031 = vmatpush.msrb.mxu1 %v902_v8  ;;  %v878_v24 = vld [vmem:[%s2075_s5 + $0x18] sm:$0xff]  ;;  %v896_v31 = vld [vmem:[%s2075_s5 + $0xa8] sm:$0xff]  ;;  %v949_v60 = vld [vmem:[%s2075_s5 + $0x250] sm:$0xff] }
  0xd9   : > { %v593_v26 = vmax.f32 %v581_v22, 0.0  ;;  %v661_v37 = vsel %vm627_vm6, %v622_v28, 0.0  ;;  %v635_v49 = vadd.f32 %v634_v36, %v633_v40  ;;  %1051 = vmatpush.msrb.mxu2 %v918_v15  ;;  %v880_v22 = vld [vmem:[%s2075_s5 + $0x28] sm:$0xff]  ;;  %v917_v28 = vld [vmem:[%s2075_s5 + $0x150] sm:$0xff]  ;;  %v934_v40 = vld [vmem:[%s2075_s5 + $0x1d8] sm:$0xff] }
  0xda   : > { %v656_v44 = vrot.slane %v655_v54, 1  ;;  %1012 = vmatpush.msrb.mxu0 %v885_v10  ;;  %1032 = vmatpush.msrb.mxu1 %v901_v11  ;;  %v953_v36 = vld [vmem:[%s2075_s5 + $0x270] sm:$0xff]  ;;  %v927_v3 = vld [vmem:[%s2075_s5 + $0x1a0] sm:$0xff]  ;;  %v946_v7 = vld [vmem:[%s2075_s5 + $0x238] sm:$0xff] }
  0xdb   : > { %v621_v29 = vmul.f32 0.055555556, %v593_v26  ;;  %v700_v51 = vsel %vm699_vm7, %v646_v46, %v635_v49  ;;  %v877_v26 = vld [vmem:[%s2075_s5 + $0x10] sm:$0xff]  ;;  %1052 = vmatpush.msrb.mxu2 %v917_v28  ;;  %v912_v46 = vld [vmem:[%s2075_s5 + $0x128] sm:$0xff]  ;;  %v891_v49 = vld [vmem:[%s2075_s5 + $0x80] sm:$0xff] }
  0xdc   : > { %v657_v48 = vadd.f32 %v656_v44, %v655_v54  ;;  %1013 = vmatpush.msrb.mxu0 %v884_v13  ;;  %1033 = vmatpush.msrb.mxu1 %v900_v14  ;;  %v914_v54 = vld [vmem:[%s2075_s5 + $0x138] sm:$0xff]  ;;  %v933_v44 = vld [vmem:[%s2075_s5 + $0x1d0] sm:$0xff]  ;;  %v947_v4 = vld [vmem:[%s2075_s5 + $0x240] sm:$0xff] }
  0xdd   : > { %v659_v33 = vsel %vm623_vm5, %v621_v29, 0.0  ;;  %v937_v29 = vld [vmem:[%s2075_s5 + $0x1f0] sm:$0xff]  ;;  %v967_v5 = vld [vmem:[%s2075_s5 + $0x2e0] sm:$0xff]  ;;  %v966_v8 = vld [vmem:[%s2075_s5 + $0x2d8] sm:$0xff] }
  0xde   : > { %v660_v35 = vadd.f32 %v659_v33, %v658_v32  ;;  %v702_v53 = vsel %vm701_vm8, %v657_v48, %v700_v51  ;;  %1014 = vmatpush.msrb.mxu0 %v883_v16  ;;  %1034 = vmatpush.msrb.mxu1 %v899_v17  ;;  %v916_v32 = vld [vmem:[%s2075_s5 + $0x148] sm:$0xff]  ;;  %v931_v51 = vld [vmem:[%s2075_s5 + $0x1c0] sm:$0xff]  ;;  %v969_v61 = vld [vmem:[%s2075_s5 + $0x2f0] sm:$0xff] }
  0xdf   : > { %v936_v33 = vld [vmem:[%s2075_s5 + $0x1e8] sm:$0xff]  ;;  %1053 = vmatpush.msrb.mxu2 %v916_v32  ;;  %v986_v9 = vld [vmem:[%s2075_s5 + $0x378] sm:$0xff]  ;;  %v925_v10 = vld [vmem:[%s2075_s5 + $0x190] sm:$0xff] }
  0xe0   : > { %v662_v39 = vadd.f32 %v661_v37, %v660_v35  ;;  %1015 = vmatpush.msrb.mxu0 %v882_v19  ;;  %1035 = vmatpush.msrb.mxu1 %v898_v20  ;;  %v895_v35 = vld [vmem:[%s2075_s5 + $0xa0] sm:$0xff]  ;;  %v952_v48 = vld [vmem:[%s2075_s5 + $0x268] sm:$0xff]  ;;  %v945_v11 = vld [vmem:[%s2075_s5 + $0x230] sm:$0xff] }
  0xe1   : > { %v915_v37 = vld [vmem:[%s2075_s5 + $0x140] sm:$0xff]  ;;  %v965_v12 = vld [vmem:[%s2075_s5 + $0x2d0] sm:$0xff]  ;;  %v924_v14 = vld [vmem:[%s2075_s5 + $0x188] sm:$0xff] }
  0xe2   : > { %v663_v41 = vrot.slane %v662_v39, 4  ;;  %1016 = vmatpush.msrb.mxu0 %v881_v21  ;;  %1036 = vmatpush.msrb.mxu1 %v897_v27  ;;  %v985_v13 = vld [vmem:[%s2075_s5 + $0x370] sm:$0xff]  ;;  %v944_v15 = vld [vmem:[%s2075_s5 + $0x228] sm:$0xff]  ;;  %v1888_v17 = vld [vmem:[%s2074_s4] sm:$0xff] }
  0xe3   : > { %1054 = vmatpush.msrb.mxu2 %v915_v37  ;;  %v964_v16 = vld [vmem:[%s2075_s5 + $0x2c8] sm:$0xff]  ;;  %v923_v19 = vld [vmem:[%s2075_s5 + $0x180] sm:$0xff]  ;;  %v1002_v27 = vld [vmem:[%s2075_s5 + $0x3f8] sm:$0xff] }
  0xe4   : > { %v664_v43 = vadd.f32 %v663_v41, %v662_v39  ;;  %1017 = vmatpush.msrb.mxu0 %v880_v22  ;;  %1037 = vmatpush.msrb.mxu1 %v896_v31  ;;  %v894_v39 = vld [vmem:[%s2075_s5 + $0x98] sm:$0xff]  ;;  %v943_v20 = vld [vmem:[%s2075_s5 + $0x220] sm:$0xff]  ;;  %v941_v28 = vld [vmem:[%s2075_s5 + $0x210] sm:$0xff] }
  0xe5   : > { %v954_v41 = vld [vmem:[%s2075_s5 + $0x278] sm:$0xff]  ;;  %1055 = vmatpush.msrb.mxu2 %v914_v54  ;;  %v963_v21 = vld [vmem:[%s2075_s5 + $0x2c0] sm:$0xff]  ;;  %v1001_v32 = vld [vmem:[%s2075_s5 + $0x3f0] sm:$0xff] }
  0xe6   : > { %v665_v45 = vrot.slane %v664_v43, 2  ;;  %1018 = vmatpush.msrb.mxu0 %v879_v23  ;;  %1038 = vmatpush.msrb.mxu1 %v895_v35  ;;  %v983_v22 = vld [vmem:[%s2075_s5 + $0x360] sm:$0xff]  ;;  %v679_v23 = vperm.slane %v1888_v17, 0  ;;  %v960_v35 = vld [vmem:[%s2075_s5 + $0x2a8] sm:$0xff] }
  0xe7   : > { %v980_v37 = vld [vmem:[%s2075_s5 + $0x348] sm:$0xff]  ;;  %v939_v54 = vld [vmem:[%s2075_s5 + $0x200] sm:$0xff] }
  0xe8   : > { %v666_v47 = vadd.f32 %v665_v45, %v664_v43  ;;  %1019 = vmatpush.msrb.mxu0 %v878_v24  ;;  %1039 = vmatpush.msrb.mxu1 %v894_v39  ;;  %v913_v43 = vld [vmem:[%s2075_s5 + $0x130] sm:$0xff]  ;;  %v892_v45 = vld [vmem:[%s2075_s5 + $0x88] sm:$0xff]  ;;  %v942_v24 = vld [vmem:[%s2075_s5 + $0x218] sm:$0xff] }
  0xe9   : > { %1056 = vmatpush.msrb.mxu2 %v913_v43  ;;  %v680_v43 = vperm.slane %v1888_v17, 1 }
  0xea   : > { %v667_v50 = vrot.slane %v666_v47, 1  ;;  %1020 = vmatpush.msrb.mxu0 %v877_v26  ;;  %1040 = vmatpush.msrb.mxu1 %v893_v42  ;;  %v982_v26 = vld [vmem:[%s2075_s5 + $0x358] sm:$0xff]  ;;  %v999_v42 = vld [vmem:[%s2075_s5 + $0x3e0] sm:$0xff] }
  0xeb   : > { %1057 = vmatpush.msrb.mxu2 %v912_v46  ;;  %v957_v46 = vld [vmem:[%s2075_s5 + $0x290] sm:$0xff] }
  0xec   : > { %v668_v52 = vadd.f32 %v667_v50, %v666_v47  ;;  %1021 = vmatpush.msrb.mxu0 %v876_v30  ;;  %v932_v47 = vld [vmem:[%s2075_s5 + $0x1c8] sm:$0xff]  ;;  %1041 = vmatpush.msrb.mxu1 %v892_v45  ;;  %v911_v50 = vld [vmem:[%s2075_s5 + $0x120] sm:$0xff]  ;;  %v981_v30 = vld [vmem:[%s2075_s5 + $0x350] sm:$0xff] }
  0xed   : > { %1058 = vmatpush.msrb.mxu2 %v911_v50  ;;  %v998_v45 = vld [vmem:[%s2075_s5 + $0x3d8] sm:$0xff] }
  0xee   : > { %v1603_v56 = vsel %vm703_vm9, %v668_v52, %v702_v53  ;;  %1022 = vmatpush.msrb.mxu0 %v875_v34  ;;  %1042 = vmatpush.msrb.mxu1 %v891_v49  ;;  %v951_v52 = vld [vmem:[%s2075_s5 + $0x260] sm:$0xff]  ;;  %v910_v53 = vld [vmem:[%s2075_s5 + $0x118] sm:$0xff]  ;;  %v940_v34 = vld [vmem:[%s2075_s5 + $0x208] sm:$0xff] }
  0xef   : > { %1293 = vmatmul.msk.f32.vlgmr.msra.gmra.mxu3 %vm623_vm5, %v1603_v56  ;;  %1059 = vmatpush.msrb.mxu2 %v910_v53  ;;  %v997_v49 = vld [vmem:[%s2075_s5 + $0x3d0] sm:$0xff]  ;;  %v996_v53 = vld [vmem:[%s2075_s5 + $0x3c8] sm:$0xff] }
  0xf0   : > { %762 = vmatpush.msra.mxu3 %v671_v55  ;;  %1087 = vmatpush.msra.mxu0 %v954_v41  ;;  %v930_v55 = vld [vmem:[%s2075_s5 + $0x1b8] sm:$0xff]  ;;  %v979_v41 = vld [vmem:[%s2075_s5 + $0x340] sm:$0xff] }
  0xf2   : > { %1088 = vmatpush.msra.mxu0 %v953_v36  ;;  %v978_v36 = vld [vmem:[%s2075_s5 + $0x338] sm:$0xff] }
  0xf4   : > { %1089 = vmatpush.msra.mxu0 %v952_v48 }
  0xf6   : > { %1090 = vmatpush.msra.mxu0 %v951_v52  ;;  %v976_v52 = vld [vmem:[%s2075_s5 + $0x328] sm:$0xff] }
  0xf7   : > { %1294 = vmatmul.msk.f32.vlgmr.msrb.gmra.mxu3 %vm623_vm5, %v1603_v56 }
  0xf8   : > { %782 = vmatpush.msrb.mxu3 %v672_v57  ;;  %v970_v57 = vld [vmem:[%s2075_s5 + $0x2f8] sm:$0xff] }
  0xf9   : > { %1107 = vmatpush.msra.mxu1 %v970_v57  ;;  %v975_v57 = vld [vmem:[%s2075_s5 + $0x320] sm:$0xff] }
  0xfb   : > { %1108 = vmatpush.msra.mxu1 %v969_v61  ;;  %v994_v61 = vld [vmem:[%s2075_s5 + $0x3b8] sm:$0xff] }
  0xfd   : > { %1109 = vmatpush.msra.mxu1 %v968_v1 }
  0xff   : > { %1295 = vmatmul.msk.f32.vlgmr.msra.gmra.mxu3 %vm623_vm5, %v1603_v56  ;;  %1110 = vmatpush.msra.mxu1 %v967_v5  ;;  %v971_v5 = vld [vmem:[%s2075_s5 + $0x300] sm:$0xff] }
 0x100   : > { %802 = vmatpush.msra.mxu3 %v673_v58  ;;  %v909_v58 = vld [vmem:[%s2075_s5 + $0x110] sm:$0xff] }
 0x101   : > { %1060 = vmatpush.msrb.mxu2 %v909_v58  ;;  %1111 = vmatpush.msra.mxu1 %v966_v8  ;;  %v995_v58 = vld [vmem:[%s2075_s5 + $0x3c0] sm:$0xff]  ;;  %v990_v8 = vld [vmem:[%s2075_s5 + $0x398] sm:$0xff] }
 0x103   : > { %1061 = vmatpush.msrb.mxu2 %v908_v62  ;;  %1112 = vmatpush.msra.mxu1 %v965_v12  ;;  %v973_v62 = vld [vmem:[%s2075_s5 + $0x310] sm:$0xff] }
 0x105   : > { %1062 = vmatpush.msrb.mxu2 %v907_v2  ;;  %1113 = vmatpush.msra.mxu1 %v964_v16  ;;  %v972_v2 = vld [vmem:[%s2075_s5 + $0x308] sm:$0xff] }
 0x107   : > { %1296 = vmatmul.msk.f32.vlgmr.msrb.gmra.mxu3 %vm623_vm5, %v1603_v56  ;;  %1127 = vmatpush.msra.mxu2 %v986_v9 }
 0x108   : > { %822 = vmatpush.msrb.mxu3 %v674_v59  ;;  %v929_v59 = vld [vmem:[%s2075_s5 + $0x1b0] sm:$0xff]  ;;  %1114 = vmatpush.msra.mxu1 %v963_v21 }
 0x109   : > { %1128 = vmatpush.msra.mxu2 %v985_v13  ;;  %v988_v13 = vld [vmem:[%s2075_s5 + $0x388] sm:$0xff] }
 0x10f   : > { %1297 = vmatmul.msk.f32.vlgmr.msra.gmra.mxu3 %vm623_vm5, %v1603_v56 }
 0x110   : > { %842 = vmatpush.msra.mxu3 %v675_v6  ;;  %v926_v6 = vld [vmem:[%s2075_s5 + $0x198] sm:$0xff] }
 0x117   : > { %1298 = vmatmul.msk.f32.vlgmr.msrb.gmra.mxu3 %vm623_vm5, %v1603_v56 }
 0x118   : > { %862 = vmatpush.msrb.mxu3 %v676_v18  ;;  %v984_v18 = vld [vmem:[%s2075_s5 + $0x368] sm:$0xff] }
 0x119   : > { %1129 = vmatpush.msra.mxu2 %v984_v18 }
 0x11b   : > { %1130 = vmatpush.msra.mxu2 %v983_v22 }
 0x11d   : > { %1131 = vmatpush.msra.mxu2 %v982_v26 }
 0x11f   : > { %1299 = vmatmul.msk.f32.vlgmr.msra.gmra.mxu3 %vm623_vm5, %v1603_v56  ;;  %1132 = vmatpush.msra.mxu2 %v981_v30 }
 0x120   : > { %1067 = vmatpush.msra.mxu3 %v938_v25  ;;  %v962_v25 = vld [vmem:[%s2075_s5 + $0x2b8] sm:$0xff] }
 0x121   : > { %1115 = vmatpush.msra.mxu1 %v962_v25  ;;  %1133 = vmatpush.msra.mxu2 %v980_v37 }
 0x122   : > { %1068 = vmatpush.msra.mxu3 %v937_v29  ;;  %v961_v29 = vld [vmem:[%s2075_s5 + $0x2b0] sm:$0xff] }
 0x123   : > { %1116 = vmatpush.msra.mxu1 %v961_v29  ;;  %1134 = vmatpush.msra.mxu2 %v979_v41 }
 0x124   : > { %1069 = vmatpush.msra.mxu3 %v936_v33 }
 0x125   : > { %1117 = vmatpush.msra.mxu1 %v960_v35  ;;  %1135 = vmatpush.msra.mxu2 %v978_v36 }
 0x126   : > { %1070 = vmatpush.msra.mxu3 %v935_v38  ;;  %v1000_v38 = vld [vmem:[%s2075_s5 + $0x3e8] sm:$0xff] }
 0x127   : > { %1300 = vmatmul.msk.f32.vlgmr.msrb.gmra.mxu3 %vm623_vm5, %v1603_v56  ;;  %v950_v56 = vld [vmem:[%s2075_s5 + $0x258] sm:$0xff] }
 0x128   : > { %1071 = vmatpush.msra.mxu3 %v934_v40  ;;  %1091 = vmatpush.msra.mxu0 %v950_v56  ;;  %v959_v40 = vld [vmem:[%s2075_s5 + $0x2a0] sm:$0xff] }
 0x129   : > { %1118 = vmatpush.msra.mxu1 %v959_v40  ;;  %v955_v56 = vld [vmem:[%s2075_s5 + $0x280] sm:$0xff] }
 0x12a   : > { %1072 = vmatpush.msra.mxu3 %v933_v44  ;;  %1092 = vmatpush.msra.mxu0 %v949_v60  ;;  %v958_v44 = vld [vmem:[%s2075_s5 + $0x298] sm:$0xff] }
 0x12b   : > { %1119 = vmatpush.msra.mxu1 %v958_v44  ;;  %v974_v60 = vld [vmem:[%s2075_s5 + $0x318] sm:$0xff] }
 0x12c   : > { %1073 = vmatpush.msra.mxu3 %v932_v47  ;;  %1093 = vmatpush.msra.mxu0 %v948_v0  ;;  %v977_v47 = vld [vmem:[%s2075_s5 + $0x330] sm:$0xff] }
 0x12d   : > { %1136 = vmatpush.msra.mxu2 %v977_v47  ;;  %1120 = vmatpush.msra.mxu1 %v957_v46  ;;  %v993_v0 = vld [vmem:[%s2075_s5 + $0x3b0] sm:$0xff] }
 0x12e   : > { %1074 = vmatpush.msra.mxu3 %v931_v51  ;;  %1094 = vmatpush.msra.mxu0 %v947_v4  ;;  %v956_v51 = vld [vmem:[%s2075_s5 + $0x288] sm:$0xff] }
 0x12f   : > { %1137 = vmatpush.msra.mxu2 %v976_v52  ;;  %1121 = vmatpush.msra.mxu1 %v956_v51 }
 0x130   : > { %1075 = vmatpush.msra.mxu3 %v930_v55  ;;  %1095 = vmatpush.msra.mxu0 %v946_v7  ;;  %v682_v7 = vperm.slane %v1888_v17, 3 }
 0x131   : > { %1122 = vmatpush.msra.mxu1 %v955_v56  ;;  %1138 = vmatpush.msra.mxu2 %v975_v57 }
 0x132   : > { %1076 = vmatpush.msra.mxu3 %v929_v59  ;;  %1096 = vmatpush.msra.mxu0 %v945_v11  ;;  %v681_v59 = vperm.slane %v1888_v17, 2 }
 0x133   : > { %1139 = vmatpush.msra.mxu2 %v974_v60 }
 0x134   : > { %1077 = vmatpush.msra.mxu3 %v928_v63  ;;  %1097 = vmatpush.msra.mxu0 %v944_v15  ;;  %v987_v15 = vld [vmem:[%s2075_s5 + $0x380] sm:$0xff] }
 0x135   : > { %1140 = vmatpush.msra.mxu2 %v973_v62 }
 0x136   : > { %1078 = vmatpush.msra.mxu3 %v927_v3  ;;  %1098 = vmatpush.msra.mxu0 %v943_v20  ;;  %v992_v3 = vld [vmem:[%s2075_s5 + $0x3a8] sm:$0xff]  ;;  %v684_v20 = vperm.slane %v1888_v17, 5 }
 0x137   : > { %1141 = vmatpush.msra.mxu2 %v972_v2 }
 0x138   : > { %1079 = vmatpush.msra.mxu3 %v926_v6  ;;  %1099 = vmatpush.msra.mxu0 %v942_v24  ;;  %v991_v6 = vld [vmem:[%s2075_s5 + $0x3a0] sm:$0xff]  ;;  %v685_v24 = vperm.slane %v1888_v17, 6 }
 0x139   : > { %1142 = vmatpush.msra.mxu2 %v971_v5 }
 0x13a   : > { %1080 = vmatpush.msra.mxu3 %v925_v10  ;;  %1100 = vmatpush.msra.mxu0 %v941_v28  ;;  %v989_v10 = vld [vmem:[%s2075_s5 + $0x390] sm:$0xff]  ;;  %v686_v28 = vperm.slane %v1888_v17, 7 }
 0x13c   : > { %1081 = vmatpush.msra.mxu3 %v924_v14  ;;  %1101 = vmatpush.msra.mxu0 %v940_v34  ;;  %v683_v14 = vperm.slane %v1888_v17, 4 }
 0x13e   : > { %1082 = vmatpush.msra.mxu3 %v923_v19  ;;  %1102 = vmatpush.msra.mxu0 %v939_v54 }
 0x140   : > { %1147 = vmatpush.msrb.mxu3 %v1002_v27 }
 0x142   : > { %1148 = vmatpush.msrb.mxu3 %v1001_v32  ;;  %v1347_v32 = vld [vmem:[%s2076_s6] ss:$0 sm:$0xff] }
 0x144   : > { %1149 = vmatpush.msrb.mxu3 %v1000_v38 }
 0x146   : > { %1150 = vmatpush.msrb.mxu3 %v999_v42 }
 0x148   : > { %1151 = vmatpush.msrb.mxu3 %v998_v45 }
 0x14a   : > { %1152 = vmatpush.msrb.mxu3 %v997_v49 }
 0x14c   : > { %1153 = vmatpush.msrb.mxu3 %v996_v53 }
 0x14e   : > { %1154 = vmatpush.msrb.mxu3 %v995_v58 }
 0x150   : > { %1155 = vmatpush.msrb.mxu3 %v994_v61 }
 0x152   : > { %1156 = vmatpush.msrb.mxu3 %v993_v0 }
 0x154   : > { %1157 = vmatpush.msrb.mxu3 %v992_v3 }
 0x156   : > { %1158 = vmatpush.msrb.mxu3 %v991_v6 }
 0x158   : > { %1159 = vmatpush.msrb.mxu3 %v990_v8 }
 0x15a   : > { %1160 = vmatpush.msrb.mxu3 %v989_v10 }
 0x15c   : > { %1161 = vmatpush.msrb.mxu3 %v988_v13 }
 0x15e   : > { %1162 = vmatpush.msrb.mxu3 %v987_v15 }
 0x172   : > { %v724_v31 = vpop.f32.mrf.mxu3 }
 0x173   : > { %v725_v33 = vadd.f32 %v724_v31, %v679_v23 }
 0x175   : > { %v867_v39 = vmax.f32 %v725_v33, 0.0 }
 0x177   : > { %1023 = vmatmul.f32.vlgmr.msrb.gmra.mxu0 %v867_v39 }
 0x17a   : > { %v744_v48 = vpop.f32.mrf.mxu3 }
 0x17b   : > { %v745_v50 = vadd.f32 %v744_v48, %v680_v43 }
 0x17d   : > { %v868_v55 = vmax.f32 %v745_v50, 0.0 }
 0x17f   : > { %1043 = vmatmul.f32.vlgmr.msrb.gmra.mxu1 %v868_v55 }
 0x182   : > { %v764_v63 = vpop.f32.mrf.mxu3 }
 0x183   : > { %v765_v1 = vadd.f32 %v764_v63, %v681_v59 }
 0x185   : > { %v869_v4 = vmax.f32 %v765_v1, 0.0 }
 0x187   : > { %1063 = vmatmul.f32.vlgmr.msrb.gmra.mxu2 %v869_v4 }
 0x18a   : > { %v784_v9 = vpop.f32.mrf.mxu3 }
 0x18b   : > { %v785_v11 = vadd.f32 %v784_v9, %v682_v7 }
 0x18d   : > { %v870_v12 = vmax.f32 %v785_v11, 0.0 }
 0x18f   : > { %1083 = vmatmul.f32.vlgmr.msra.gmra.mxu3 %v870_v12 }
 0x192   : > { %v804_v16 = vpop.f32.mrf.mxu3 }
 0x193   : > { %v805_v18 = vadd.f32 %v804_v16, %v683_v14 }
 0x195   : > { %v871_v19 = vmax.f32 %v805_v18, 0.0 }
 0x197   : > { %1103 = vmatmul.f32.vlgmr.msra.gmra.mxu0 %v871_v19 }
 0x19a   : > { %v824_v21 = vpop.f32.mrf.mxu3 }
 0x19b   : > { %v825_v22 = vadd.f32 %v824_v21, %v684_v20 }
 0x19d   : > { %v872_v23 = vmax.f32 %v825_v22, 0.0 }
 0x19f   : > { %1123 = vmatmul.f32.vlgmr.msra.gmra.mxu1 %v872_v23 }
 0x1a2   : > { %v844_v25 = vpop.f32.mrf.mxu3 }
 0x1a3   : > { %v845_v26 = vadd.f32 %v844_v25, %v685_v24 }
 0x1a5   : > { %v873_v27 = vmax.f32 %v845_v26, 0.0 }
 0x1a7   : > { %1143 = vmatmul.f32.vlgmr.msra.gmra.mxu2 %v873_v27 }
 0x1aa   : > { %v864_v29 = vpop.f32.mrf.mxu3 }
 0x1ab   : > { %v865_v30 = vadd.f32 %v864_v29, %v686_v28 }
 0x1ad   : > { %v874_v31 = vmax.f32 %v865_v30, 0.0 }
 0x1af   : > { %1163 = vmatmul.f32.vlgmr.msrb.gmra.mxu3 %v874_v31 }
 0x1f4   : > { %v1024_v33 = vpop.f32.mrf.mxu0 }
 0x1f5   : > { %v1025_v35 = vadd.f32 %v1347_v32, %v1024_v33 }
 0x1fc   : > { %v1044_v34 = vpop.f32.mrf.mxu1 }
 0x1fd   : > { %v1045_v38 = vadd.f32 %v1044_v34, %v1025_v35 }
 0x20a   : > { %v1064_v37 = vpop.f32.mrf.mxu2 }
 0x20b   : > { %v1065_v54 = vadd.f32 %v1064_v37, %v1045_v38 }
 0x212   : > { %v1084_v39 = vpop.f32.mrf.mxu3 }
 0x213   : > { %v1085_v40 = vadd.f32 %v1084_v39, %v1065_v54 }
 0x214   : > { %v1104_v41 = vpop.f32.mrf.mxu0 }
 0x215   : > { %v1105_v17 = vadd.f32 %v1104_v41, %v1085_v40 }
 0x21c   : > { %v1124_v42 = vpop.f32.mrf.mxu1 }
 0x21d   : > { %v1125_v44 = vadd.f32 %v1124_v42, %v1105_v17 }
 0x22a   : > { %v1144_v43 = vpop.f32.mrf.mxu2 }
 0x22b   : > { %v1145_v36 = vadd.f32 %v1144_v43, %v1125_v44 }
 0x232   : > { %v1164_v45 = vpop.f32.mrf.mxu3 }
 0x233   : > { %v1165_v46 = vadd.f32 %v1164_v45, %v1145_v36 }
 0x235   : > { %v1167_v47 = vsel %vm316_vm0, %v1165_v46, -inf }
 0x236   : > { %1168 = vmax.xlane.f32.xlu0 %v1167_v47 }
 0x2a9   : > { %v1169_v48 = vpop.xlane.xlu0 %1168 }
 0x2aa   : > { %v1170_v49 = vsub.f32 %v1165_v46, %v1169_v48 }
 0x2ac   : > { %v1171_v50 = vmul.f32 1.442695, %v1170_v49 }
 0x2ae   : > { %1348 = vpow2.f32 %v1171_v50 }
 0x2b4   : > { %v1349_v51 = vpop.eup %1348 }
 0x2b5   : > { %v1173_v52 = vsel %vm316_vm0, %v1349_v51, 0.0 }
 0x2b6   : > { %1174 = vadd.xlane.f32.xlu0 %v1173_v52 }
 0x329   : > { %v1175_v53 = vpop.xlane.xlu0 %1174 }
 0x32a   : > { %1350 = vlog2.f32 %v1175_v53 }
 0x330   : > { %v1351_v55 = vpop.eup %1350 }
 0x331   : > { %v1177_v56 = vmul.f32 0.6931472, %v1351_v55 }
 0x333   : > { %v1178_v57 = vsub.f32 %v1170_v49, %v1177_v56 }
 0x335   : > { %1179 = vst [vmem:[%s274_s13] sm:$0xf] %v1178_v57 }
 0x336   : > { %1379 = shalt.err (!%p1376_p3)
}
 0x337   : > { %1306 = dma.vmem_to_hbm [thread:$0]  (%p1492_p5), %s1194_s14, 64, %s1196_s15, %s1181_s16  }
 0x338 PF: > { %p1312_p4 = scmp.ge.s32.totalorder %s1414_s27, 2  ;;  %s1207_s23 = sand.u32 1, %s1402_s24  }
 0x339   : > { %s1208_s29 = scalar_lea.sflag [#allocation3], %s1207_s23 }
 0x33a   : > { %p1309_p7 = pnand %p1312_p4, %p1496_p6 }
 0x33c   : > { %p1310_p8 = pneg %p1309_p7 }
 0x33e   : > { %1397 = dma.done.wait (%p1310_p8), %s1208_s29, 64  }
 0x33f   : > { %1399 = vsyncadd (%p1310_p8), %s1208_s29, 4294967232  ;;  %p17_p9 = scmp.ge.s32.totalorder %s1480_s30, 4   ;;  %s2080_s24 = smov %s1406_s25 }
 0x340   : > { %s2081_s25 = smov %s1410_s26  ;;  %s2082_s26 = smov %s1490_s10 }
 0x341   : > { %s2083_s27 = smov %s1480_s30  ;;  %19 = sbr.rel (!%p17_p9) target bundleno = 3 (0x3), region = 85 }
 0x346   :  { %1214 = vsyncpa [#allocation3], 1 }
 0x347   :  { %1216 = vsyncpa [#allocation3 + $0x1], 1 }

</bundles_post_ra>
